<compile_context>
chip_gen: v7x
topology: tpu7x:2x2x1
jax: 0.10.0
libtpu: 0.0.40
codegen_flags: <defaults>
</compile_context>

<pallas_src>
import functools

import numpy as np

import jax
import jax.numpy as jnp
from jax.experimental import pallas as pl
from jax.experimental.pallas import tpu as pltpu


# --------------------------- Path A: fused single pass -----------------------


def ca_fused_kernel(x_ref, wd_ref, bd_ref, wu_ref, bu_ref, o_ref, *, inv_hw):
    """Fused channel attention for a (TN, C, HW) batch tile.

    x_ref : (TN, C, HW)  images; channels on sublanes, flattened spatial on lanes
    wd_ref: (C, Cr)      down-projection weight, pre-transposed (= W_down.T)
    bd_ref: (1, Cr)
    wu_ref: (C, Cr)      up-projection weight (= W_up)
    bu_ref: (C, 1)
    o_ref : (TN, C, HW)  out = x * sigmoid(W_up @ silu(W_down @ pool(x) + bd) + bu)
    """
    # Global average pool: f32 accumulate straight off the ref (the upcast only
    # feeds the reduction -- no full-slab f32 value is kept live).
    pooled = jnp.sum(x_ref[...].astype(jnp.float32), axis=2) * inv_hw        # (TN, C)

    # Squeeze/excite MLP on VPU/XLU (M = TN is far too small for the MXU).
    z = jnp.sum(pooled[:, :, None] * wd_ref[...], axis=1) + bd_ref[...]      # (TN, Cr)
    z = z * jax.nn.sigmoid(z)                                                # SiLU
    s = jnp.sum(z[:, None, :] * wu_ref[...], axis=2) + bu_ref[...][:, 0]     # (TN, C)
    s = jax.nn.sigmoid(s)                                                    # f32

    # Second read of the block in its native dtype; scale and store directly
    # (no intermediate f32 copy of the slab, bf16 inputs multiply in bf16).
    o_ref[...] = x_ref[...] * s[:, :, None].astype(o_ref.dtype)


def _fused_forward(x3, wd_t, bd, wu, bu):
    N, C, hw = x3.shape
    Cr = wd_t.shape[1]
    itemsize = jnp.dtype(x3.dtype).itemsize
    img_bytes = C * hw * itemsize

    # Batch TN images per grid step so each block is a few MiB, but keep >= 2
    # parallel grid points when N > 1 (v7x has 2 TensorCores per chip).
    target_block = 4 * 1024 * 1024
    tn = max(1, min(N, target_block // max(img_bytes, 1)))
    if N > 1:
        tn = min(tn, -(-N // 2))
    grid = (pl.cdiv(N, tn),)

    weight_bytes = 4 * int(wd_t.size + bd.size + wu.size + bu.size)
    # Double-buffered in + out blocks, weights, headroom; capped below v7x's
    # physical 64 MiB VMEM, above the 16/32 MiB scoped defaults.
    need = 4 * tn * img_bytes + weight_bytes
    vmem_limit = int(min(48 * 2**20, max(16 * 2**20, int(1.25 * need) + 2**20)))

    cost = pl.CostEstimate(
        flops=int(N * (2 * C * hw + 4 * C * Cr)),
        transcendentals=int(N * (C + Cr)),
        bytes_accessed=int(2 * N * C * hw * itemsize + weight_bytes),
    )

    return pl.pallas_call(
        functools.partial(ca_fused_kernel, inv_hw=1.0 / hw),
        out_shape=jax.ShapeDtypeStruct((N, C, hw), x3.dtype),
        grid=grid,
        in_specs=[
            pl.BlockSpec((tn, C, hw), lambda b: (b, 0, 0)),
            pl.BlockSpec((C, Cr), lambda b: (0, 0)),
            pl.BlockSpec((1, Cr), lambda b: (0, 0)),
            pl.BlockSpec((C, Cr), lambda b: (0, 0)),
            pl.BlockSpec((C, 1), lambda b: (0, 0)),
        ],
        out_specs=pl.BlockSpec((tn, C, hw), lambda b: (b, 0, 0)),
        compiler_params=pltpu.CompilerParams(
            dimension_semantics=("parallel",),
            vmem_limit_bytes=vmem_limit,
        ),
        cost_estimate=cost,
    )(x3, wd_t, bd, wu, bu)


# ------------------------ Path B: two-pass spatially tiled -------------------


def ca_pool_mlp_kernel(x_ref, wd_ref, bd_ref, wu_ref, bu_ref, s_ref, acc_ref, *,
                       hw, tile):
    """Pass 1: spatially tiled global-average pool + squeeze/excite MLP.

    Grid (N, HW/tile).  acc_ref is a (C, 1) f32 running sum; the per-channel
    scale s is computed and stored on the last spatial tile of each image.
    """
    k = pl.program_id(1)

    @pl.when(k == 0)
    def _():
        acc_ref[...] = jnp.zeros_like(acc_ref)

    xt = x_ref[0].astype(jnp.float32)                                        # (C, T)
    # Mask out-of-range lanes of a partial last tile (hw need not divide tile).
    lane = jax.lax.broadcasted_iota(jnp.int32, xt.shape, 1)
    xt = jnp.where(lane < (hw - k * tile), xt, 0.0)
    acc_ref[...] += jnp.sum(xt, axis=1, keepdims=True)                       # (C, 1)

    @pl.when(k == pl.num_programs(1) - 1)
    def _():
        pooled = acc_ref[...] * (1.0 / hw)                                   # (C, 1)
        z = jnp.sum(wd_ref[...] * pooled, axis=0, keepdims=True) + bd_ref[...]  # (1, Cr)
        z = z * jax.nn.sigmoid(z)                                            # SiLU
        s = jnp.sum(wu_ref[...] * z, axis=1, keepdims=True) + bu_ref[...]    # (C, 1)
        s_ref[0] = jax.nn.sigmoid(s)


def ca_scale_kernel(x_ref, s_ref, o_ref):
    """Pass 2: stream (1, C, T) tiles of x and apply the per-channel scale."""
    o_ref[...] = x_ref[...] * s_ref[...].astype(o_ref.dtype)


def _tiled_forward(x3, wd_t, bd, wu, bu, tile):
    N, C, hw = x3.shape
    Cr = wd_t.shape[1]
    itemsize = jnp.dtype(x3.dtype).itemsize
    n_tiles = pl.cdiv(hw, tile)
    weight_bytes = 4 * int(wd_t.size + bd.size + wu.size + bu.size)
    tile_bytes = C * tile * itemsize
    vmem_limit = int(min(48 * 2**20,
                         max(16 * 2**20, 6 * tile_bytes + weight_bytes + 2**20)))

    # ---- pass 1: pooled sum -> per-channel scale s of shape (N, C, 1), f32 ----
    pool_cost = pl.CostEstimate(
        flops=int(N * (C * hw + 4 * C * Cr)),
        transcendentals=int(N * (C + Cr)),
        bytes_accessed=int(N * C * hw * itemsize + weight_bytes + N * C * 4),
    )
    s = pl.pallas_call(
        functools.partial(ca_pool_mlp_kernel, hw=hw, tile=tile),
        out_shape=jax.ShapeDtypeStruct((N, C, 1), jnp.float32),
        grid=(N, n_tiles),
        in_specs=[
            pl.BlockSpec((1, C, tile), lambda n, k: (n, 0, k)),
            pl.BlockSpec((C, Cr), lambda n, k: (0, 0)),
            pl.BlockSpec((1, Cr), lambda n, k: (0, 0)),
            pl.BlockSpec((C, Cr), lambda n, k: (0, 0)),
            pl.BlockSpec((C, 1), lambda n, k: (0, 0)),
        ],
        out_specs=pl.BlockSpec((1, C, 1), lambda n, k: (n, 0, 0)),
        scratch_shapes=[pltpu.VMEM((C, 1), jnp.float32)],
        compiler_params=pltpu.CompilerParams(
            dimension_semantics=("parallel", "arbitrary"),
            vmem_limit_bytes=vmem_limit,
        ),
        cost_estimate=pool_cost,
    )(x3, wd_t, bd, wu, bu)

    # ---- pass 2: out = x * s, fully parallel streaming scale ----
    # TODO(synk): use pipeline_mode=pl.Buffered(3) on x only if profiling shows
    # exposed DMA; default depth 2 is normally fully hidden for this stream.
    scale_cost = pl.CostEstimate(
        flops=int(N * C * hw),
        transcendentals=0,
        bytes_accessed=int(2 * N * C * hw * itemsize + N * C * 4),
    )
    return pl.pallas_call(
        ca_scale_kernel,
        out_shape=jax.ShapeDtypeStruct((N, C, hw), x3.dtype),
        grid=(N, n_tiles),
        in_specs=[
            pl.BlockSpec((1, C, tile), lambda n, k: (n, 0, k)),
            pl.BlockSpec((1, C, 1), lambda n, k: (n, 0, 0)),
        ],
        out_specs=pl.BlockSpec((1, C, tile), lambda n, k: (n, 0, k)),
        compiler_params=pltpu.CompilerParams(
            dimension_semantics=("parallel", "parallel"),
            vmem_limit_bytes=vmem_limit,
        ),
        cost_estimate=scale_cost,
    )(x3, s)


# --------------------------------- wrapper -----------------------------------


def channel_attention_forward(x, wd_t, bd, wu, bu, *, spatial_tile=None,
                              fused_block_limit=8 * 2**20):
    """x: (N, C, *spatial).  Returns x * ChannelAttention(x), same shape/dtype."""
    N, C = x.shape[0], x.shape[1]
    hw = int(np.prod(x.shape[2:]))
    itemsize = jnp.dtype(x.dtype).itemsize
    img_bytes = C * hw * itemsize

    # NCHW / NCDHW is contiguous in (C, prod(spatial)) per image -> layout-free.
    # TODO(synk): if prod(spatial) % 128 != 0 and W % 128 == 0, fold H into the
    # sublane axis with C instead, to keep stores fully lane-dense.
    x3 = x.reshape(N, C, hw)

    tile = spatial_tile
    if tile is None and img_bytes > fused_block_limit:
        # Default spatial tile ~2 MiB per (1, C, T) block, multiple of 128 lanes.
        tile = max(128, ((2 * 2**20) // (C * itemsize)) // 128 * 128)

    if tile is not None and hw > int(tile):
        out3 = _tiled_forward(x3, wd_t, bd, wu, bu, int(tile))
    else:
        out3 = _fused_forward(x3, wd_t, bd, wu, bu)
    return out3.reshape(x.shape)


# -------------------------------- reference -----------------------------------


def ref_channel_attention(x, wd_t, bd, wu, bu):
    """Plain-JAX mirror of PyTorch ChannelAttention.forward (NC*spatial)."""
    spatial_axes = tuple(range(2, x.ndim))
    pooled = jnp.mean(x.astype(jnp.float32), axis=spatial_axes)    # (N, C)
    z = pooled @ wd_t + bd                                         # (N, Cr)
    z = jax.nn.silu(z)
    s = jax.nn.sigmoid(z @ wu.T + bu[:, 0][None, :])               # (N, C)
    s = s.reshape(s.shape + (1,) * len(spatial_axes)).astype(x.dtype)
    return x * s


# ---------------------------------- main --------------------------------------


if __name__ == "__main__":
    N, C, H, W = 2, 8, 16, 16
    reduction = 4
    Cr = C // reduction

    key = jax.random.PRNGKey(0)
    kx, k1, k2, k3, k4 = jax.random.split(key, 5)
    x = jax.random.normal(kx, (N, C, H, W), jnp.float32)
    wd_t = 0.3 * jax.random.normal(k1, (C, Cr), jnp.float32)   # = W_down.T
    bd = 0.1 * jax.random.normal(k2, (1, Cr), jnp.float32)
    wu = 0.3 * jax.random.normal(k3, (C, Cr), jnp.float32)     # = W_up
    bu = 0.1 * jax.random.normal(k4, (C, 1), jnp.float32)

    ref = np.asarray(ref_channel_attention(x, wd_t, bd, wu, bu))

    # Path A: fused single pass (auto-selected for small images).
    out_fused = jax.block_until_ready(
        jax.jit(channel_attention_forward)(x, wd_t, bd, wu, bu))
    np.testing.assert_allclose(np.asarray(out_fused), ref, rtol=1e-5, atol=1e-5)

    # Path B: two-pass spatially tiled (forced; what large images / v7x use).
    tiled_fn = jax.jit(functools.partial(channel_attention_forward, spatial_tile=128))
    out_tiled = jax.block_until_ready(tiled_fn(x, wd_t, bd, wu, bu))
    np.testing.assert_allclose(np.asarray(out_tiled), ref, rtol=1e-5, atol=1e-5)

    # ndim=3 module variant with a spatial extent that is NOT a multiple of the
    # tile (hw = 240), exercising both paths and the partial-tile masking.
    x3d = jax.random.normal(kx, (2, C, 4, 6, 10), jnp.float32)
    ref3d = np.asarray(ref_channel_attention(x3d, wd_t, bd, wu, bu))
    out3d = jax.block_until_ready(
        jax.jit(channel_attention_forward)(x3d, wd_t, bd, wu, bu))
    np.testing.assert_allclose(np.asarray(out3d), ref3d, rtol=1e-5, atol=1e-5)
    out3d_t = jax.block_until_ready(tiled_fn(x3d, wd_t, bd, wu, bu))
    np.testing.assert_allclose(np.asarray(out3d_t), ref3d, rtol=1e-5, atol=1e-5)

    print("KERNEL_OK")
</pallas_src>

<mosaic_0001>
module attributes {stable_mosaic.version = 11 : i64} {
  func.func @ca_fused_kernel(%arg0: i32, %arg1: memref<1x8x256xf32, #tpu.memory_space<vmem>>, %arg2: memref<8x2xf32, #tpu.memory_space<vmem>>, %arg3: memref<1x2xf32, #tpu.memory_space<vmem>>, %arg4: memref<8x2xf32, #tpu.memory_space<vmem>>, %arg5: memref<8x1xf32, #tpu.memory_space<vmem>>, %arg6: memref<1x8x256xf32, #tpu.memory_space<vmem>>) attributes {dimension_semantics = [#tpu.dimension_semantics<parallel>], iteration_bounds = array<i64: 2>, scalar_prefetch = 0 : i64, scratch_operands = 0 : i64, tpu.core_type = #tpu.core_type<tc>, window_params = [{transform_indices = @transform_0, window_bounds = array<i64: 1, 8, 256>}, {pipeline_mode = #tpu.pipeline_mode<synchronous>, transform_indices = @transform_1, window_bounds = array<i64: 8, 2>}, {pipeline_mode = #tpu.pipeline_mode<synchronous>, transform_indices = @transform_2, window_bounds = array<i64: 1, 2>}, {pipeline_mode = #tpu.pipeline_mode<synchronous>, transform_indices = @transform_3, window_bounds = array<i64: 8, 2>}, {pipeline_mode = #tpu.pipeline_mode<synchronous>, transform_indices = @transform_4, window_bounds = array<i64: 8, 1>}, {transform_indices = @transform_5, window_bounds = array<i64: 1, 8, 256>}]} {
    %c0 = arith.constant 0 : index
    %c0_0 = arith.constant 0 : index
    %c0_1 = arith.constant 0 : index
    %0 = vector.load %arg1[%c0, %c0_0, %c0_1] : memref<1x8x256xf32, #tpu.memory_space<vmem>>, vector<1x8x256xf32>
    %cst = arith.constant dense<0.000000e+00> : vector<1x8xf32>
    %1 = vector.multi_reduction <add>, %0, %cst [2] : vector<1x8x256xf32> to vector<1x8xf32>
    %cst_2 = arith.constant 3.906250e-03 : f32
    %2 = vector.broadcast %cst_2 : f32 to vector<1x8xf32>
    %3 = arith.mulf %1, %2 : vector<1x8xf32>
    %4 = vector.shape_cast %3 : vector<1x8xf32> to vector<1x8x1xf32>
    %c0_3 = arith.constant 0 : index
    %c0_4 = arith.constant 0 : index
    %5 = vector.load %arg2[%c0_3, %c0_4] : memref<8x2xf32, #tpu.memory_space<vmem>>, vector<8x2xf32>
    %6 = vector.shape_cast %5 : vector<8x2xf32> to vector<1x8x2xf32>
    %7 = vector.broadcast %4 : vector<1x8x1xf32> to vector<1x8x2xf32>
    %8 = arith.mulf %7, %6 : vector<1x8x2xf32>
    %cst_5 = arith.constant dense<0.000000e+00> : vector<1x2xf32>
    %9 = vector.multi_reduction <add>, %8, %cst_5 [1] : vector<1x8x2xf32> to vector<1x2xf32>
    %c0_6 = arith.constant 0 : index
    %c0_7 = arith.constant 0 : index
    %10 = vector.load %arg3[%c0_6, %c0_7] : memref<1x2xf32, #tpu.memory_space<vmem>>, vector<1x2xf32>
    %11 = arith.addf %9, %10 : vector<1x2xf32>
    %12 = arith.negf %11 : vector<1x2xf32>
    %13 = math.exp %12 : vector<1x2xf32>
    %cst_8 = arith.constant 1.000000e+00 : f32
    %14 = vector.broadcast %cst_8 : f32 to vector<1x2xf32>
    %15 = arith.addf %14, %13 : vector<1x2xf32>
    %16 = arith.divf %14, %15 : vector<1x2xf32>
    %17 = arith.mulf %11, %16 : vector<1x2xf32>
    %18 = vector.shape_cast %17 : vector<1x2xf32> to vector<1x1x2xf32>
    %c0_9 = arith.constant 0 : index
    %c0_10 = arith.constant 0 : index
    %19 = vector.load %arg4[%c0_9, %c0_10] : memref<8x2xf32, #tpu.memory_space<vmem>>, vector<8x2xf32>
    %20 = vector.shape_cast %19 : vector<8x2xf32> to vector<1x8x2xf32>
    %21 = vector.broadcast %18 : vector<1x1x2xf32> to vector<1x8x2xf32>
    %22 = arith.mulf %21, %20 : vector<1x8x2xf32>
    %cst_11 = arith.constant dense<0.000000e+00> : vector<1x8xf32>
    %23 = vector.multi_reduction <add>, %22, %cst_11 [2] : vector<1x8x2xf32> to vector<1x8xf32>
    %c0_12 = arith.constant 0 : index
    %c0_13 = arith.constant 0 : index
    %24 = vector.load %arg5[%c0_12, %c0_13] : memref<8x1xf32, #tpu.memory_space<vmem>>, vector<8x1xf32>
    %25 = vector.shape_cast %24 : vector<8x1xf32> to vector<8xf32>
    %26 = vector.shape_cast %25 : vector<8xf32> to vector<1x8xf32>
    %27 = arith.addf %23, %26 : vector<1x8xf32>
    %28 = arith.negf %27 : vector<1x8xf32>
    %29 = math.exp %28 : vector<1x8xf32>
    %cst_14 = arith.constant 1.000000e+00 : f32
    %30 = vector.broadcast %cst_14 : f32 to vector<1x8xf32>
    %31 = arith.addf %30, %29 : vector<1x8xf32>
    %32 = arith.divf %30, %31 : vector<1x8xf32>
    %c0_15 = arith.constant 0 : index
    %c0_16 = arith.constant 0 : index
    %c0_17 = arith.constant 0 : index
    %33 = vector.load %arg1[%c0_15, %c0_16, %c0_17] : memref<1x8x256xf32, #tpu.memory_space<vmem>>, vector<1x8x256xf32>
    %34 = vector.shape_cast %32 : vector<1x8xf32> to vector<1x8x1xf32>
    %35 = vector.broadcast %34 : vector<1x8x1xf32> to vector<1x8x256xf32>
    %36 = arith.mulf %33, %35 : vector<1x8x256xf32>
    %c0_18 = arith.constant 0 : index
    %c0_19 = arith.constant 0 : index
    %c0_20 = arith.constant 0 : index
    %37 = vector.load %arg6[%c0_18, %c0_19, %c0_20] : memref<1x8x256xf32, #tpu.memory_space<vmem>>, vector<1x8x256xf32>
    tpu.vector_store %arg6[%c0_18, %c0_19, %c0_20], %36 {strides = array<i32>} : memref<1x8x256xf32, #tpu.memory_space<vmem>>, vector<1x8x256xf32>,
    return
  }
  func.func @transform_0(%arg0: i32) -> (i32, i32, i32) {
    %c0_i32 = arith.constant 0 : i32
    %c0_i32_0 = arith.constant 0 : i32
    %c0_i32_1 = arith.constant 0 : i32
    return %arg0, %c0_i32, %c0_i32_0 : i32, i32, i32
  }
  func.func @transform_1(%arg0: i32) -> (i32, i32) {
    %c0_i32 = arith.constant 0 : i32
    %c0_i32_0 = arith.constant 0 : i32
    %c0_i32_1 = arith.constant 0 : i32
    return %c0_i32, %c0_i32_0 : i32, i32
  }
  func.func @transform_2(%arg0: i32) -> (i32, i32) {
    %c0_i32 = arith.constant 0 : i32
    %c0_i32_0 = arith.constant 0 : i32
    %c0_i32_1 = arith.constant 0 : i32
    return %c0_i32, %c0_i32_0 : i32, i32
  }
  func.func @transform_3(%arg0: i32) -> (i32, i32) {
    %c0_i32 = arith.constant 0 : i32
    %c0_i32_0 = arith.constant 0 : i32
    %c0_i32_1 = arith.constant 0 : i32
    return %c0_i32, %c0_i32_0 : i32, i32
  }
  func.func @transform_4(%arg0: i32) -> (i32, i32) {
    %c0_i32 = arith.constant 0 : i32
    %c0_i32_0 = arith.constant 0 : i32
    %c0_i32_1 = arith.constant 0 : i32
    return %c0_i32, %c0_i32_0 : i32, i32
  }
  func.func @transform_5(%arg0: i32) -> (i32, i32, i32) {
    %c0_i32 = arith.constant 0 : i32
    %c0_i32_0 = arith.constant 0 : i32
    %c0_i32_1 = arith.constant 0 : i32
    return %arg0, %c0_i32, %c0_i32_0 : i32, i32, i32
  }
}

</mosaic_0001>

<bundles_post_ra>
// kernel: channel_attention_forward.1
= control target key start
LH: loop header
LB: loop body
LE: loop exit
PB: predicated region body
PF: predicated region fallthrough
CT: control target
= control target key end

     0   :  { %s404_s18 = smov 0   ;;  %s442_s0 = inlined_call_operand.vmem [shape: f32[2,8,256], index: 0, kind: input, shape index: {}]   ;;  %s443_s1 = inlined_call_operand.vmem [shape: f32[8,2], index: 1, kind: input, shape index: {}]   ;;  %s444_s2 = inlined_call_operand.vmem [shape: f32[1,2], index: 2, kind: input, shape index: {}]   ;;  %s445_s3 = inlined_call_operand.vmem [shape: f32[8,2], index: 3, kind: input, shape index: {}]   ;;  %s446_s4 = inlined_call_operand.vmem [shape: f32[8,1], index: 4, kind: input, shape index: {}]   ;;  %s447_s5 = inlined_call_operand.vmem [shape: f32[2,8,256], index: 5, kind: output, shape index: {}]  }
   0x1 LB: > { %s331_s19 = sadd.s32 4294967295, %s371_s18   ;;  %p335_p0 = scmp.ge.s32.totalorder %s371_s18, 1  ;;  %s371_s18 = sphi %s404_s18, %s15_s18  }
   0x2   : > { %p187_p1 = scmp.lt.s32.totalorder %s371_s18, 3 }
   0x4   : > { %p188_p2 = pnand %p335_p0, %p187_p1 }
   0x5   : > { %p215_p3 = scmp.lt.s32.totalorder (!%p188_p2), %s331_s19, 1  ;;  %v231_v3 = vld [vmem:[%s443_s1] sm:$0xff] (!%p188_p2)  ;;  %vm233_vm0 = vcmask (!%p188_p2), 15360   ;;  %v251_v19 = vlaneseq (!%p188_p2)  ;;  %v373_v28 = vmov (!%p188_p2), 0  }
   0x6   : > { %191 = sbr.rel (%p188_p2) target bundleno = 514 (0x202), region = 40  ;;  %v241_v13 = vld [vmem:[%s444_s2] sm:$0x1] (!%p188_p2)  ;;  %355 = vset.pattern.permute.xlu1 (!%p188_p2), %v373_v28  ;;  %356 = vset.pattern.permute.xlu0 (!%p188_p2), %v373_v28 }
   0x7   : > { %v252_v20 = vshrl.u32 (!%p188_p2), %v251_v19, 7  ;;  %v250_v24 = vld [vmem:[%s445_s3] sm:$0xff] (!%p188_p2) }
   0x8   : > { %v259_v29 = vld [vmem:[%s446_s4] sm:$0xff] (!%p188_p2) }
   0x9   : > { %v253_v21 = vsub.s32 (!%p188_p2), 0, %v252_v20 }
   0xd   : > { %s449_s19 = smov (!%p215_p3, %s331_s19), 1 }
   0xe   : > { %s344_s20 = sshll.u32 %s449_s19, 4 }
   0xf   : > { %s219_s23 = scalar_lea.vmem %s442_s0, %s344_s20  ;;  %s224_s9 = scalar_lea.vmem %s447_s5, %s344_s20 }
  0x10   : > { %v225_v0 = vld [vmem:[%s219_s23] sm:$0xff]  ;;  %v226_v1 = vld [vmem:[%s219_s23 + $0x8] sm:$0xff] }
  0x11   : > { %v227_v2 = vadd.f32 %v226_v1, %v225_v0 }
  0x13   : > { %228 = vadd.xlane.f32.xlu0 %v227_v2 }
  0xa0   : > { %v229_v4 = vpop.xlane.xlu0 %228 }
  0xa1   : > { %v230_v5 = vmul.f32 0.00390625, %v229_v4 }
  0xa3   : > { %v232_v6 = vmul.f32 %v231_v3, %v230_v5 }
  0xa5   : > { %v234_v7 = vsel %vm233_vm0, %v232_v6, 0.0 }
  0xa6   : > { %v235_v8 = vrot.slane %v234_v7, 4 }
  0xa8   : > { %v236_v9 = vadd.f32 %v235_v8, %v234_v7 }
  0xaa   : > { %v237_v10 = vrot.slane %v236_v9, 2 }
  0xac   : > { %v238_v11 = vadd.f32 %v237_v10, %v236_v9 }
  0xae   : > { %v239_v12 = vrot.slane %v238_v11, 1 }
  0xb0   : > { %v240_v14 = vadd.f32 %v239_v12, %v238_v11 }
  0xb2   : > { %v242_v15 = vadd.f32 %v241_v13, %v240_v14 }
  0xb4   : > { %v340_v16 = vmul.f32 -1.442695, %v242_v15 }
  0xb6   : > { %357 = vpow2.f32 %v340_v16 }
  0xc0   : > { %v358_v17 = vpop.eup %357 }
  0xc1   : > { %v246_v18 = vadd.f32 1.0, %v358_v17 }
  0xc3   : > { %359 = vrcp.f32 %v246_v18 }
  0xcd   : > { %v360_v22 = vpop.eup %359 }
  0xce   : > { %v249_v23 = vmul.f32 %v360_v22, %v242_v15 }
  0xd0   : > { %v254_v25 = vrot.slane %v249_v23, %v253_v21 }
  0xd2   : > { %v255_v26 = vmul.f32 %v254_v25, %v250_v24 }
  0xd4   : > { %v256_v27 = vsel %vm233_vm0, %v255_v26, 0.0 }
  0xd5   : > { %257 = vadd.xlane.f32.xlu0 %v256_v27 }
 0x162   : > { %v258_v30 = vpop.xlane.xlu0 %257 }
 0x163   : > { %v260_v31 = vadd.f32 %v259_v29, %v258_v30 }
 0x165   : > { %v341_v32 = vmul.f32 -1.442695, %v260_v31 }
 0x167   : > { %361 = vpow2.f32 %v341_v32 }
 0x171   : > { %v362_v33 = vpop.eup %361 }
 0x172   : > { %v264_v34 = vadd.f32 1.0, %v362_v33 }
 0x174   : > { %363 = vrcp.f32 %v264_v34 }
 0x17e   : > { %v364_v35 = vpop.eup %363 }
 0x17f   : > { %269 = vperm.xlu1 %355, %v364_v35  }
 0x1fe   : > { %v270_v36 = vpop.permute.xlu1 %269 }
 0x1ff   : > { %v272_v37 = vmul.f32 %v270_v36, %v225_v0  ;;  %v273_v38 = vmul.f32 %v270_v36, %v226_v1 }
 0x201   : > { %274 = vst [vmem:[%s224_s9] sm:$0xff] %v272_v37  ;;  %275 = vst [vmem:[%s224_s9 + $0x8] sm:$0xff] %v273_v38 }
 0x202 PF: > { %s15_s18 = sadd.s32 1, %s371_s18  }
 0x203   : > { %p12_p4 = scmp.ge.s32.totalorder %s15_s18, 4  }
 0x205   :  { %14 = sbr.rel (!%p12_p4) target bundleno = 1 (0x1), region = 70 }

</bundles_post_ra>
